<compile_context>
chip_gen: v7x
topology: tpu7x:2x2x1
jax: 0.10.0
libtpu: 0.0.40
codegen_flags: <defaults>
</compile_context>

<pallas_src>
import functools

import numpy as np
import jax
import jax.numpy as jnp
from jax.experimental import pallas as pl
from jax.experimental.pallas import tpu as pltpu

_LANE = 128                    # lane quantum (last dim multiple -> unmasked vst)
_MAX_COLS = 1024               # widest lane-dense last dim we try (8 * 128)
_BLOCK_BYTES_CAP = 4 << 20     # ~4 MiB/block -> 4 live buffers <= 16 MiB (v7x safe)


def _sublanes_for(dtype) -> int:
    """Dtype-aware sublane quantum: fp32 -> 8, bf16 -> 16, int8/fp8 -> 32."""
    return max(8, 32 // np.dtype(dtype).itemsize)


def _identity_kernel(x_ref, o_ref):
    # The preprocessing "slot".  The base class defines no transform of its
    # own; a concrete child replaces this body with real work (normalization,
    # feature stacking, ...) while keeping the lane-dense tiling below.
    o_ref[...] = x_ref[...]


def _lane_dense_shape(n: int, dtype):
    """Pick a (rows, cols) lane-dense layout with minimal padding.

    cols is the largest multiple of 128 (<= _MAX_COLS) dividing the padded
    element count; rows is a multiple of the dtype's sublane quantum.
    """
    sub = _sublanes_for(dtype)
    quantum = sub * _LANE                      # minimal (sublane, lane) tile
    padded = -(-n // quantum) * quantum        # pad only to this small quantum
    k = padded // quantum
    b = 1
    for cand in range(min(k, _MAX_COLS // _LANE), 0, -1):
        if k % cand == 0:
            b = cand
            break
    cols = b * _LANE
    rows = padded // cols
    return rows, cols, padded


def _pick_tile_rows(rows: int, cols: int, itemsize: int, sub: int) -> int:
    """Largest divisor of rows (multiple of `sub`) whose block fits the byte cap."""
    cap_d = max(1, _BLOCK_BYTES_CAP // (sub * cols * itemsize))
    a = rows // sub
    for d in range(min(a, cap_d), 0, -1):
        if a % d == 0:
            return d * sub
    return sub


def _passthrough_pallas(x_2d: jax.Array) -> jax.Array:
    """Pallas preprocessing slot on a lane-dense (rows, cols) array."""
    rows, cols = x_2d.shape
    itemsize = np.dtype(x_2d.dtype).itemsize
    sub = _sublanes_for(x_2d.dtype)
    tile_r = _pick_tile_rows(rows, cols, itemsize, sub)
    grid = (rows // tile_r,)                   # exact: tile_r divides rows
    block_bytes = tile_r * cols * itemsize
    vmem_budget = 4 * block_bytes + (1 << 20)  # 2x in + 2x out double buffers + slack
    return pl.pallas_call(
        _identity_kernel,
        out_shape=jax.ShapeDtypeStruct((rows, cols), x_2d.dtype),
        grid=grid,
        in_specs=[pl.BlockSpec((tile_r, cols), lambda i: (i, 0))],
        out_specs=pl.BlockSpec((tile_r, cols), lambda i: (i, 0)),
        # Safe only while the in/out index maps are elementwise identical
        # (identity copy).  Avoids a second output allocation; it does NOT
        # remove the HBM read/write traffic.
        input_output_aliases={0: 0},
        cost_estimate=pl.CostEstimate(
            flops=0,
            transcendentals=0,
            bytes_accessed=2 * rows * cols * itemsize,
        ),
        compiler_params=pltpu.CompilerParams(
            dimension_semantics=("parallel",),
            vmem_limit_bytes=int(vmem_budget),
        ),
    )(x_2d)


@functools.partial(jax.jit, donate_argnums=(0,))
def _preprocess(x: jax.Array) -> jax.Array:
    """flatten -> minimal pad -> Pallas slot -> unpad -> reshape, fused under jit."""
    orig_shape = x.shape
    flat = x.reshape(-1)
    n = flat.shape[0]
    rows, cols, padded = _lane_dense_shape(n, x.dtype)
    if padded != n:
        flat = jnp.pad(flat, (0, padded - n))
    y_2d = _passthrough_pallas(flat.reshape(rows, cols))
    return y_2d.reshape(-1)[:n].reshape(orig_shape)


class AgentBase:
    """JAX/Pallas port of sc2rl.rl.agents.AgentBase (abstract RL-agent interface)."""

    def __init__(self, brain_conf=None, buffer_conf=None):
        self.brain_conf = brain_conf
        self.buffer_conf = buffer_conf
        # No parameters/weights: the PyTorch __init__ registers none.
        self.brain = None    # TODO(synk): supplied by a concrete child class.
        self.buffer = None   # TODO(synk): supplied by a concrete child class.
        # The base class has no preprocessing; the Pallas slot is skipped
        # entirely unless a child turns it on.
        self.has_preprocess = False

    def forward(self, *args, **kwargs):
        # Exact semantics of the PyTorch base class.
        raise NotImplementedError(
            'This method will be implemented in the child class')

    def __call__(self, *args, **kwargs):
        return self.forward(*args, **kwargs)

    def get_action(self, x: jax.Array) -> jax.Array:
        """1. pre-process  2. brain.get_action  3. post-process."""
        # 1. Preprocessing slot: elided for the base class (identity) so it
        #    costs nothing; jit-fused Pallas path when a child enables it.
        y = _preprocess(x) if self.has_preprocess else x
        # 2. TODO(synk): self.brain.get_action(y) — brain is abstract here.
        # 3. No post-processing in the base class.
        return y

    def fit(self, *args, **kwargs):
        raise NotImplementedError(
            'This method will be implemented in the child class')

    def append_sample(self, sample):
        # TODO(synk): self.buffer.push(sample) — buffer is abstract in the base class.
        raise NotImplementedError('Buffer is provided by the child class')


if __name__ == "__main__":
    key = jax.random.PRNGKey(0)
    # Small NCHW input consistent with what a concrete SC2 agent would consume.
    x = jax.random.normal(key, (2, 4, 16, 16), dtype=jnp.float32)
    x_host = np.asarray(jax.device_get(x))   # snapshot: x is donated below

    agent = AgentBase(brain_conf={}, buffer_conf={})

    # forward() must raise, exactly like the PyTorch base class.
    raised = False
    try:
        agent(x)
    except NotImplementedError:
        raised = True
    assert raised, "forward() should raise NotImplementedError"

    # Base-class fast path: identity preprocess is elided — no kernel launch,
    # no HBM traffic, the very same array comes back.
    y_fast = agent.get_action(x)
    assert y_fast is x

    # Exercise the Pallas preprocessing slot (what a concrete child enables).
    agent.has_preprocess = True
    y = agent.get_action(x)
    y = jax.block_until_ready(y)
    assert y.shape == x_host.shape and y.dtype == x_host.dtype
    assert np.array_equal(np.asarray(jax.device_get(y)), x_host)

    print("KERNEL_OK")
</pallas_src>

<mosaic_0001>
module attributes {stable_mosaic.version = 11 : i64} {
  func.func @_identity_kernel(%arg0: i32, %arg1: memref<8x256xf32, #tpu.memory_space<vmem>>, %arg2: memref<8x256xf32, #tpu.memory_space<vmem>>) attributes {dimension_semantics = [#tpu.dimension_semantics<parallel>], iteration_bounds = array<i64: 1>, scalar_prefetch = 0 : i64, scratch_operands = 0 : i64, tpu.core_type = #tpu.core_type<tc>, window_params = [{transform_indices = @transform_0, window_bounds = array<i64: 8, 256>}, {transform_indices = @transform_1, window_bounds = array<i64: 8, 256>}]} {
    %c0 = arith.constant 0 : index
    %c0_0 = arith.constant 0 : index
    %0 = vector.load %arg1[%c0, %c0_0] : memref<8x256xf32, #tpu.memory_space<vmem>>, vector<8x256xf32>
    %c0_1 = arith.constant 0 : index
    %c0_2 = arith.constant 0 : index
    %1 = vector.load %arg2[%c0_1, %c0_2] : memref<8x256xf32, #tpu.memory_space<vmem>>, vector<8x256xf32>
    tpu.vector_store %arg2[%c0_1, %c0_2], %0 {strides = array<i32>} : memref<8x256xf32, #tpu.memory_space<vmem>>, vector<8x256xf32>,
    return
  }
  func.func @transform_0(%arg0: i32) -> (i32, i32) {
    %c0_i32 = arith.constant 0 : i32
    %c0_i32_0 = arith.constant 0 : i32
    return %arg0, %c0_i32 : i32, i32
  }
  func.func @transform_1(%arg0: i32) -> (i32, i32) {
    %c0_i32 = arith.constant 0 : i32
    %c0_i32_0 = arith.constant 0 : i32
    return %arg0, %c0_i32 : i32, i32
  }
}

</mosaic_0001>

<bundles_post_ra>
// kernel: _preprocess.1
= control target key start
LH: loop header
LB: loop body
LE: loop exit
PB: predicated region body
PF: predicated region fallthrough
CT: control target
= control target key end

     0   :  { %s38_s0 = inlined_call_operand.vmem [shape: f32[8,256], index: 0, kind: input, shape index: {}, may-alias: {0,1}]   ;;  %s39_s1 = inlined_call_operand.vmem [shape: f32[8,256], index: 1, kind: output, shape index: {}, may-alias: {0,1}]  }
   0x1   :  { %v8_v0 = vld [vmem:[%s38_s0] sm:$0xff]  ;;  %v9_v1 = vld [vmem:[%s38_s0 + $0x8] sm:$0xff] }
   0x2   :  { %10 = vst [vmem:[%s39_s1] sm:$0xff] %v8_v0  ;;  %11 = vst [vmem:[%s39_s1 + $0x8] sm:$0xff] %v9_v1 }

</bundles_post_ra>
